<compile_context>
chip_gen: v6e
topology: v6e:2x2x1
jax: 0.10.0
libtpu: 0.0.40
codegen_flags: <defaults>
</compile_context>

<pallas_src>
import functools

import numpy as np
import jax
import jax.numpy as jnp
from jax.experimental import pallas as pl
from jax.experimental.pallas import tpu as pltpu


# ----------------------------------------------------------------------------
# Kernel 1: temporal gated conv
#   grid = (T_out, K); t parallel, k is the temporal-tap reduction axis.
#   The three conv weights are fused along the output-channel axis, so each
#   (t, k) step is a single (R, Cin) @ (Cin, 3*Cout) MXU matmul.
# ----------------------------------------------------------------------------
def _tgated_conv_kernel(x_ref, w_ref, b_ref, o_ref, acc_ref):
    # x_ref  : (1, R, Cin)        time-row t+k of the time-major activation
    # w_ref  : (1, Cin, 3*Cout)   fused [W1 | W2 | W3] for temporal tap k
    # b_ref  : (1, 3*Cout)        fused [b1 | b2 | b3]
    # o_ref  : (1, R, Cout)
    # acc_ref: (R, 3*Cout) f32    accumulator over the K temporal taps
    k = pl.program_id(1)

    @pl.when(k == 0)
    def _init():
        acc_ref[...] = jnp.zeros_like(acc_ref)

    xk = x_ref[0].astype(jnp.bfloat16)          # bf16 MXU operands,
    wk = w_ref[0].astype(jnp.bfloat16)          # f32 accumulation
    acc_ref[...] += jnp.dot(xk, wk, preferred_element_type=jnp.float32)

    @pl.when(k == pl.num_programs(1) - 1)
    def _finalize():
        cout = o_ref.shape[-1]
        z = acc_ref[...] + b_ref[...]           # (R, 3*Cout)
        p = z[:, :cout]
        q = z[:, cout:2 * cout]
        r = z[:, 2 * cout:]
        # TemporalGatedConv gate: relu(P * sigmoid(Q) + conv3)
        o_ref[0] = jnp.maximum(p * jax.nn.sigmoid(q) + r, 0.0)


def temporal_gated_conv(x, w1, w2, w3, b1, b2, b3):
    """x: [T, R, Cin] (time-major, R = B*N) -> [T-K+1, R, Cout]."""
    T, R, Cin = x.shape
    K, _, Cout = w1.shape
    T_out = T - K + 1
    # Fuse the three conv weights / biases along the output-channel axis (glue).
    w_cat = jnp.concatenate([w1, w2, w3], axis=-1)   # (K, Cin, 3*Cout)
    b_cat = jnp.concatenate([b1, b2, b3], axis=-1)   # (1, 3*Cout)

    # TODO(synk): for very large R (= B*N) add a row-tile grid axis over R; at these
    # sizes one (R, Cin) block per step already fits VMEM with double-buffering.
    return pl.pallas_call(
        _tgated_conv_kernel,
        out_shape=jax.ShapeDtypeStruct((T_out, R, Cout), jnp.float32),
        grid=(T_out, K),
        in_specs=[
            pl.BlockSpec((1, R, Cin), lambda t, k: (t + k, 0, 0)),
            pl.BlockSpec((1, Cin, 3 * Cout), lambda t, k: (k, 0, 0)),
            pl.BlockSpec((1, 3 * Cout), lambda t, k: (0, 0)),
        ],
        out_specs=pl.BlockSpec((1, R, Cout), lambda t, k: (t, 0, 0)),
        scratch_shapes=[pltpu.VMEM((R, 3 * Cout), jnp.float32)],
        compiler_params=pltpu.CompilerParams(
            dimension_semantics=("parallel", "arbitrary")),
    )(x, w_cat, b_cat)


# ----------------------------------------------------------------------------
# Kernel 2: dense single-head GAT + GraphNorm + ReLU, Tb time steps per grid step
# ----------------------------------------------------------------------------
def _gat_graphnorm_kernel(x_ref, adj_ref, w_ref, asrc_ref, adst_ref,
                          bias_ref, gw_ref, gb_ref, gms_ref, o_ref,
                          *, num_graphs):
    # x_ref : (Tb, NB, H)   adj_ref : (NB, NB)   w_ref : (H, H)
    # asrc/adst/bias/gw/gb/gms : (1, H)          o_ref : (Tb, NB, H)
    tb, NB, H = x_ref.shape
    n_per_graph = NB // num_graphs

    # GAT linear transform: one MXU matmul over all Tb*NB rows (bf16 operands).
    x2d = x_ref[...].reshape(tb * NB, H)
    h2d = jnp.dot(x2d.astype(jnp.bfloat16), w_ref[...].astype(jnp.bfloat16),
                  preferred_element_type=jnp.float32)
    h = h2d.reshape(tb, NB, H)                                    # (Tb, NB, H)

    # Attention logits e[t,i,j] = LeakyReLU(a_dst.h_i + a_src.h_j) via VPU
    # lane reductions (no degenerate 1-wide matmuls through the MXU).
    a_dst = jnp.sum(h * adst_ref[...], axis=-1, keepdims=True)    # (Tb, NB, 1)
    a_src = jnp.sum(h * asrc_ref[...], axis=-1)                   # (Tb, NB)
    e = a_dst + a_src[:, None, :]                                 # (Tb, NB, NB)
    e = jnp.where(e > 0, e, 0.2 * e)                              # LeakyReLU(0.2)

    mask = (adj_ref[...] > 0.0)[None]                             # (1, NB, NB)
    e = jnp.where(mask, e, -1e30)
    e = e - jnp.max(e, axis=-1, keepdims=True)
    p = jnp.where(mask, jnp.exp(e), 0.0)
    attn = p / jnp.sum(p, axis=-1, keepdims=True)

    out = jnp.einsum('tij,tjh->tih',
                     attn.astype(jnp.bfloat16), h.astype(jnp.bfloat16),
                     preferred_element_type=jnp.float32) + bias_ref[...]

    # GraphNorm: per-graph mean/var via reduction over the node axis
    # (node index = g * n_per_graph + n, as implied by the module's .view()).
    og = out.reshape(tb, num_graphs, n_per_graph, H)
    mean = jnp.mean(og, axis=2, keepdims=True)
    cent = og - gms_ref[...] * mean
    var = jnp.mean(cent * cent, axis=2, keepdims=True)
    normed = gw_ref[...] * cent * jax.lax.rsqrt(var + 1e-5) + gb_ref[...]

    # fused outer F.relu
    o_ref[...] = jnp.maximum(normed, 0.0).reshape(tb, NB, H)


def gat_graphnorm_relu(x, adj, num_graphs, w, asrc, adst, bias, gw, gb, gms,
                       max_time_block=8):
    """x: [T, NB, H] time-major -> [T, NB, H]; GAT + GraphNorm + ReLU per time step."""
    T, NB, H = x.shape
    tb = 1
    for c in range(min(max_time_block, T), 0, -1):   # largest divisor of T <= 8
        if T % c == 0:
            tb = c
            break
    kernel = functools.partial(_gat_graphnorm_kernel, num_graphs=num_graphs)
    const2 = lambda t: (0, 0)

    # TODO(synk): for large NB, single-buffer the grid-invariant adj/weights
    # (pipeline_mode=pl.Buffered(1)) and tile NB; irrelevant at these sizes.
    return pl.pallas_call(
        kernel,
        out_shape=jax.ShapeDtypeStruct((T, NB, H), jnp.float32),
        grid=(T // tb,),
        in_specs=[
            pl.BlockSpec((tb, NB, H), lambda t: (t, 0, 0)),
            pl.BlockSpec((NB, NB), const2),
            pl.BlockSpec((H, H), const2),
            pl.BlockSpec((1, H), const2),
            pl.BlockSpec((1, H), const2),
            pl.BlockSpec((1, H), const2),
            pl.BlockSpec((1, H), const2),
            pl.BlockSpec((1, H), const2),
            pl.BlockSpec((1, H), const2),
        ],
        out_specs=pl.BlockSpec((tb, NB, H), lambda t: (t, 0, 0)),
        compiler_params=pltpu.CompilerParams(dimension_semantics=("parallel",)),
    )(x, adj, w, asrc, adst, bias, gw, gb, gms)


# ----------------------------------------------------------------------------
# Full forward
# ----------------------------------------------------------------------------
def tgconv_ngat_forward(x, params, adj, num_graphs):
    # x: [B, T, N, Cin]
    B, T, N, Cin = x.shape
    xt = x.transpose(1, 0, 2, 3).reshape(T, B * N, Cin)          # time-major glue
    h = temporal_gated_conv(xt, *params["tconv1"])               # [T1, B*N, H]
    h = gat_graphnorm_relu(h, adj, num_graphs,
                           *params["gat"], *params["gnorm"])     # [T1, B*N, H]
    out = temporal_gated_conv(h, *params["tconv2"])              # [T2, B*N, O]
    T2, _, Cout = out.shape
    return out.reshape(T2, B, N, Cout).transpose(1, 0, 2, 3)     # [B, T2, N, O]


# ----------------------------------------------------------------------------
# Pure-JAX reference (same math, mirrors the bf16 MXU-operand casts so the
# check isolates kernel structure; all element-wise math stays f32).
# ----------------------------------------------------------------------------
def _mm_bf16(a, b):
    return jnp.dot(a.astype(jnp.bfloat16), b.astype(jnp.bfloat16),
                   preferred_element_type=jnp.float32)


def _ref_tconv(x, w1, w2, w3, b1, b2, b3):
    T, R, Cin = x.shape
    K, _, Cout = w1.shape
    T_out = T - K + 1

    def conv(w, b):
        acc = jnp.zeros((T_out, R, Cout), jnp.float32)
        for k in range(K):
            xk = x[k:k + T_out].reshape(T_out * R, Cin)
            acc = acc + _mm_bf16(xk, w[k]).reshape(T_out, R, Cout)
        return acc + b.reshape(1, 1, Cout)

    p, q, r = conv(w1, b1), conv(w2, b2), conv(w3, b3)
    return jax.nn.relu(p * jax.nn.sigmoid(q) + r)


def _ref_gat(x, adj, num_graphs, w, asrc, adst, bias, gw, gb, gms):
    T, NB, H = x.shape
    h = _mm_bf16(x.reshape(T * NB, H), w).reshape(T, NB, H)
    a_dst = jnp.sum(h * adst, axis=-1, keepdims=True)
    a_src = jnp.sum(h * asrc, axis=-1)
    e = a_dst + a_src[:, None, :]
    e = jnp.where(e > 0, e, 0.2 * e)
    mask = (adj > 0.0)[None]
    e = jnp.where(mask, e, -1e30)
    e = e - e.max(axis=-1, keepdims=True)
    p = jnp.where(mask, jnp.exp(e), 0.0)
    attn = p / p.sum(axis=-1, keepdims=True)
    out = jnp.einsum('tij,tjh->tih', attn.astype(jnp.bfloat16),
                     h.astype(jnp.bfloat16),
                     preferred_element_type=jnp.float32) + bias
    n_per = NB // num_graphs
    og = out.reshape(T, num_graphs, n_per, H)
    mean = og.mean(axis=2, keepdims=True)
    cent = og - gms * mean
    var = (cent * cent).mean(axis=2, keepdims=True)
    normed = gw * cent * jax.lax.rsqrt(var + 1e-5) + gb
    return jax.nn.relu(normed).reshape(T, NB, H)


def _ref_forward(x, params, adj, num_graphs):
    B, T, N, Cin = x.shape
    xt = x.transpose(1, 0, 2, 3).reshape(T, B * N, Cin)
    h = _ref_tconv(xt, *params["tconv1"])
    h = _ref_gat(h, adj, num_graphs, *params["gat"], *params["gnorm"])
    out = _ref_tconv(h, *params["tconv2"])
    T2, _, Cout = out.shape
    return out.reshape(T2, B, N, Cout).transpose(1, 0, 2, 3)


# ----------------------------------------------------------------------------
# main
# ----------------------------------------------------------------------------
if __name__ == "__main__":
    # module hyper-parameters (small, consistent with the forward)
    B, T, N = 2, 12, 8            # batch, seq_len, num_nodes
    C_IN, HID, C_OUT, K = 4, 32, 8, 3

    key = jax.random.PRNGKey(0)
    ks = jax.random.split(key, 13)

    def w_init(k, shape, fan_in):
        return (jax.random.normal(k, shape, jnp.float32) / np.sqrt(fan_in)).astype(jnp.float32)

    params = {
        # TemporalGatedConv 1: Conv2d(C_IN, HID, (1, K)) x3 -> weights stored as (K, Cin, Cout)
        "tconv1": (
            w_init(ks[0], (K, C_IN, HID), K * C_IN),
            w_init(ks[1], (K, C_IN, HID), K * C_IN),
            w_init(ks[2], (K, C_IN, HID), K * C_IN),
            w_init(ks[3], (1, HID), HID) * 0.1,
            w_init(ks[4], (1, HID), HID) * 0.1,
            w_init(ks[5], (1, HID), HID) * 0.1,
        ),
        # GATConv(HID, HID, heads=1): lin weight (H,H), att_src/att_dst (1,H), bias (1,H)
        "gat": (
            w_init(ks[6], (HID, HID), HID),
            w_init(ks[7], (1, HID), HID),
            w_init(ks[8], (1, HID), HID),
            jnp.zeros((1, HID), jnp.float32),
        ),
        # GraphNorm(HID): weight=1, bias=0, mean_scale=1 (PyG defaults)
        "gnorm": (
            jnp.ones((1, HID), jnp.float32),
            jnp.zeros((1, HID), jnp.float32),
            jnp.ones((1, HID), jnp.float32),
        ),
        # TemporalGatedConv 2: HID -> C_OUT
        "tconv2": (
            w_init(ks[9], (K, HID, C_OUT), K * HID),
            w_init(ks[10], (K, HID, C_OUT), K * HID),
            w_init(ks[11], (K, HID, C_OUT), K * HID),
            jnp.zeros((1, C_OUT), jnp.float32),
            jnp.zeros((1, C_OUT), jnp.float32),
            jnp.zeros((1, C_OUT), jnp.float32),
        ),
    }

    # graph: bidirectional ring inside each batch element, batched into NB = B*N nodes
    NB = B * N
    src, dst = [], []
    for b in range(B):
        for i in range(N):
            j = (i + 1) % N
            src += [b * N + i, b * N + j]
            dst += [b * N + j, b * N + i]
    edge_index = np.stack([np.array(src), np.array(dst)])          # [2, num_edges]

    # densify: adjacency A[dst, src] = 1 (+ self loops, GATConv default add_self_loops=True)
    A = np.zeros((NB, NB), np.float32)
    A[edge_index[1], edge_index[0]] = 1.0
    A[np.arange(NB), np.arange(NB)] = 1.0
    adj = jnp.asarray(A)

    # input  x: [B, T, N, C_IN]
    x = jax.random.normal(ks[12], (B, T, N, C_IN), jnp.float32)
    # TODO(synk): edge_weight is accepted by the PyTorch module but unused here
    # (PyG GATConv without edge_dim does not consume scalar edge weights); dropout=0.0.
    # TODO(synk): GraphNorm assumes batch = repeat(arange(B), N), as implied by the
    # module's .view(batch_size * num_nodes, C); ragged batches are not supported.

    out = tgconv_ngat_forward(x, params, adj, num_graphs=B)
    out = jax.block_until_ready(out)
    assert out.shape == (B, T - 2 * (K - 1), N, C_OUT), out.shape

    ref = jax.block_until_ready(_ref_forward(x, params, adj, num_graphs=B))
    assert np.allclose(np.asarray(out), np.asarray(ref), atol=5e-3, rtol=5e-3), \
        float(np.max(np.abs(np.asarray(out) - np.asarray(ref))))

    print("KERNEL_OK")
</pallas_src>

<mosaic_0001>
module attributes {stable_mosaic.version = 11 : i64} {
  func.func @_tgated_conv_kernel(%arg0: i32, %arg1: i32, %arg2: memref<1x16x4xf32, #tpu.memory_space<vmem>>, %arg3: memref<1x4x96xf32, #tpu.memory_space<vmem>>, %arg4: memref<1x96xf32, #tpu.memory_space<vmem>>, %arg5: memref<1x16x32xf32, #tpu.memory_space<vmem>>, %arg6: memref<16x96xf32, #tpu.memory_space<vmem>>) attributes {dimension_semantics = [#tpu.dimension_semantics<parallel>, #tpu.dimension_semantics<arbitrary>], iteration_bounds = array<i64: 10, 3>, scalar_prefetch = 0 : i64, scratch_operands = 1 : i64, tpu.core_type = #tpu.core_type<tc>, window_params = [{transform_indices = @transform_0, window_bounds = array<i64: 1, 16, 4>}, {transform_indices = @transform_1, window_bounds = array<i64: 1, 4, 96>}, {pipeline_mode = #tpu.pipeline_mode<synchronous>, transform_indices = @transform_2, window_bounds = array<i64: 1, 96>}, {transform_indices = @transform_3, window_bounds = array<i64: 1, 16, 32>}]} {
    %c0_i32 = arith.constant 0 : i32
    %0 = arith.cmpi eq, %arg1, %c0_i32 : i32
    %1 = arith.extui %0 : i1 to i32
    %c0_i32_0 = arith.constant 0 : i32
    %2 = arith.cmpi ne, %1, %c0_i32_0 : i32
    scf.if %2 {
      %cst_11 = arith.constant 0.000000e+00 : f32
      %16 = vector.broadcast %cst_11 : f32 to vector<16x96xf32>
      %c0_12 = arith.constant 0 : index
      %c0_13 = arith.constant 0 : index
      %17 = vector.load %arg6[%c0_12, %c0_13] : memref<16x96xf32, #tpu.memory_space<vmem>>, vector<16x96xf32>
      tpu.vector_store %arg6[%c0_12, %c0_13], %16 {strides = array<i32>} : memref<16x96xf32, #tpu.memory_space<vmem>>, vector<16x96xf32>,
    } else {
    }
    %c0 = arith.constant 0 : index
    %c0_1 = arith.constant 0 : index
    %c0_2 = arith.constant 0 : index
    %3 = vector.load %arg2[%c0, %c0_1, %c0_2] : memref<1x16x4xf32, #tpu.memory_space<vmem>>, vector<1x16x4xf32>
    %4 = vector.shape_cast %3 : vector<1x16x4xf32> to vector<16x4xf32>
    %5 = arith.truncf %4 : vector<16x4xf32> to vector<16x4xbf16>
    %c0_3 = arith.constant 0 : index
    %c0_4 = arith.constant 0 : index
    %c0_5 = arith.constant 0 : index
    %6 = vector.load %arg3[%c0_3, %c0_4, %c0_5] : memref<1x4x96xf32, #tpu.memory_space<vmem>>, vector<1x4x96xf32>
    %7 = vector.shape_cast %6 : vector<1x4x96xf32> to vector<4x96xf32>
    %8 = arith.truncf %7 : vector<4x96xf32> to vector<4x96xbf16>
    %c0_6 = arith.constant 0 : index
    %c0_7 = arith.constant 0 : index
    %9 = vector.load %arg6[%c0_6, %c0_7] : memref<16x96xf32, #tpu.memory_space<vmem>>, vector<16x96xf32>
    %cst = arith.constant dense<0.000000e+00> : vector<16x96xf32>
    %10 = tpu.matmul %5, %8, %cst {dimension_numbers = #tpu.dot_dimension_numbers<[1], [0], [0], [1], [0, 0, 1, 1], [], []>} : vector<16x4xbf16>, vector<4x96xbf16>, vector<16x96xf32> -> vector<16x96xf32>
    %11 = arith.addf %9, %10 : vector<16x96xf32>
    %c0_8 = arith.constant 0 : index
    %c0_9 = arith.constant 0 : index
    %12 = vector.load %arg6[%c0_8, %c0_9] : memref<16x96xf32, #tpu.memory_space<vmem>>, vector<16x96xf32>
    tpu.vector_store %arg6[%c0_8, %c0_9], %11 {strides = array<i32>} : memref<16x96xf32, #tpu.memory_space<vmem>>, vector<16x96xf32>,
    %c2_i32 = arith.constant 2 : i32
    %13 = arith.cmpi eq, %arg1, %c2_i32 : i32
    %14 = arith.extui %13 : i1 to i32
    %c0_i32_10 = arith.constant 0 : i32
    %15 = arith.cmpi ne, %14, %c0_i32_10 : i32
    scf.if %15 {
      %c0_11 = arith.constant 0 : index
      %c0_12 = arith.constant 0 : index
      %16 = vector.load %arg6[%c0_11, %c0_12] : memref<16x96xf32, #tpu.memory_space<vmem>>, vector<16x96xf32>
      %c0_13 = arith.constant 0 : index
      %c0_14 = arith.constant 0 : index
      %17 = vector.load %arg4[%c0_13, %c0_14] : memref<1x96xf32, #tpu.memory_space<vmem>>, vector<1x96xf32>
      %18 = vector.broadcast %17 : vector<1x96xf32> to vector<16x96xf32>
      %19 = arith.addf %16, %18 : vector<16x96xf32>
      %20 = vector.extract_strided_slice %19 {offsets = [0, 0], sizes = [16, 32], strides = [1, 1]} : vector<16x96xf32> to vector<16x32xf32>
      %21 = vector.extract_strided_slice %19 {offsets = [0, 32], sizes = [16, 32], strides = [1, 1]} : vector<16x96xf32> to vector<16x32xf32>
      %22 = vector.extract_strided_slice %19 {offsets = [0, 64], sizes = [16, 32], strides = [1, 1]} : vector<16x96xf32> to vector<16x32xf32>
      %23 = arith.negf %21 : vector<16x32xf32>
      %24 = math.exp %23 : vector<16x32xf32>
      %cst_15 = arith.constant 1.000000e+00 : f32
      %25 = vector.broadcast %cst_15 : f32 to vector<16x32xf32>
      %26 = arith.addf %25, %24 : vector<16x32xf32>
      %27 = arith.divf %25, %26 : vector<16x32xf32>
      %28 = arith.mulf %20, %27 : vector<16x32xf32>
      %29 = arith.addf %28, %22 : vector<16x32xf32>
      %cst_16 = arith.constant 0.000000e+00 : f32
      %30 = vector.broadcast %cst_16 : f32 to vector<16x32xf32>
      %31 = arith.maximumf %29, %30 : vector<16x32xf32>
      %c0_17 = arith.constant 0 : index
      %c0_18 = arith.constant 0 : index
      %c0_19 = arith.constant 0 : index
      %32 = vector.load %arg5[%c0_17, %c0_18, %c0_19] : memref<1x16x32xf32, #tpu.memory_space<vmem>>, vector<1x16x32xf32>
      %33 = vector.shape_cast %32 : vector<1x16x32xf32> to vector<16x32xf32>
      %34 = vector.shape_cast %31 : vector<16x32xf32> to vector<1x16x32xf32>
      tpu.vector_store %arg5[%c0_17, %c0_18, %c0_19], %34 {strides = array<i32>} : memref<1x16x32xf32, #tpu.memory_space<vmem>>, vector<1x16x32xf32>,
    } else {
    }
    return
  }
  func.func @transform_0(%arg0: i32, %arg1: i32) -> (i32, i32, i32) {
    %0 = arith.addi %arg0, %arg1 : i32
    %c0_i32 = arith.constant 0 : i32
    %c0_i32_0 = arith.constant 0 : i32
    %c0_i32_1 = arith.constant 0 : i32
    return %0, %c0_i32, %c0_i32_0 : i32, i32, i32
  }
  func.func @transform_1(%arg0: i32, %arg1: i32) -> (i32, i32, i32) {
    %c0_i32 = arith.constant 0 : i32
    %c0_i32_0 = arith.constant 0 : i32
    %c0_i32_1 = arith.constant 0 : i32
    return %arg1, %c0_i32, %c0_i32_0 : i32, i32, i32
  }
  func.func @transform_2(%arg0: i32, %arg1: i32) -> (i32, i32) {
    %c0_i32 = arith.constant 0 : i32
    %c0_i32_0 = arith.constant 0 : i32
    %c0_i32_1 = arith.constant 0 : i32
    return %c0_i32, %c0_i32_0 : i32, i32
  }
  func.func @transform_3(%arg0: i32, %arg1: i32) -> (i32, i32, i32) {
    %c0_i32 = arith.constant 0 : i32
    %c0_i32_0 = arith.constant 0 : i32
    %c0_i32_1 = arith.constant 0 : i32
    return %arg0, %c0_i32, %c0_i32_0 : i32, i32, i32
  }
}

</mosaic_0001>

<bundles_post_ra>
// kernel: tpu_custom_call.1
= control target key start
LH: loop header
LB: loop body
LE: loop exit
PB: predicated region body
PF: predicated region fallthrough
CT: control target
= control target key end

     0   :  { %8 = vsyncpa [#allocation4], 0  ;;  %s816_s0 = inlined_call_operand.vmem [shape: f32[12,16,4], index: 0, kind: input, shape index: {}]   ;;  %s817_s1 = inlined_call_operand.vmem [shape: f32[3,4,96], index: 1, kind: input, shape index: {}]   ;;  %s818_s2 = inlined_call_operand.vmem [shape: f32[1,96], index: 2, kind: input, shape index: {}]   ;;  %s819_s3 = inlined_call_operand.hbm [shape: f32[10,16,32], index: 3, kind: output, shape index: {}]  }
   0x1   :  { %10 = vsyncpa [#allocation4 + $0x1], 0  ;;  %s663_s12 = smov 0   ;;  %s665_s13 = smov 0  }
   0x2   :  { %s667_s14 = smov 0   ;;  %s669_s15 = smov 0  }
   0x3   :  { %s671_s16 = smov 0   ;;  %s673_s17 = smov 0  }
   0x4   :  { %s675_s18 = smov 0   ;;  %s677_s19 = smov 0  }
   0x5 LB: > { %s425_s20 = sadd.s32 4294967295, %s633_s19   ;;  %s426_s21 = sadd.s32 4294967294, %s633_s19   ;;  %s633_s19 = sphi %s677_s19, %s16_s19   ;;  %s629_s18 = sphi %s675_s18, %s828_s18   ;;  %s625_s17 = sphi %s673_s17, %s827_s17   ;;  %s621_s16 = sphi %s671_s16, %s826_s16   ;;  %s617_s15 = sphi %s669_s15, %s825_s15   ;;  %s613_s14 = sphi %s667_s14, %s824_s14   ;;  %s609_s13 = sphi %s665_s13, %s823_s13   ;;  %s605_s12 = sphi %s663_s12, %s822_s12  }
   0x6   : > { %s25_s22 = sadd.s32 1, %s625_s17  ;;  %s28_s23 = sadd.s32 1, %s629_s18 }
   0x7   : > { %p26_p0 = scmp.ge.s32.totalorder %s25_s22, 3  ;;  %p120_p1 = scmp.ne.s32.totalorder %s613_s14, %s609_s13 }
   0x8   : > { %p121_p2 = scmp.eq.s32.totalorder %s425_s20, 29  ;;  %p126_p4 = scmp.ne.s32.totalorder %s609_s13, %s605_s12 }
   0x9   : > { %s830_s22 = smov (%p26_p0, %s25_s22), 0  ;;  %s832_s23 = smov (!%p26_p0, %s28_s23), %s629_s18 }
   0xa   : > { %p712_p3 = por %p121_p2, %p120_p1  ;;  %p30_p5 = scmp.ge.s32.totalorder %s832_s23, 10 }
   0xb   : > { %p127_p6 = scmp.eq.s32.totalorder %s426_s21, 29  ;;  %p429_p7 = scmp.ge.s32.totalorder %s633_s19, 1 }
   0xc   : > { %p165_p8 = scmp.lt.s32.totalorder %s633_s19, 31  ;;  %s834_s23 = smov (%p30_p5, %s832_s23), 0 }
   0xd   : > { %p722_p9 = por %p127_p6, %p126_p4  ;;  %s107_s26 = ssub.s32 %s629_s18, %s834_s23 }
   0xe   : > { %p166_p10 = pnand %p429_p7, %p165_p8  ;;  %s110_s27 = sadd.s32 1, %s613_s14 }
   0xf   : > { %p108_p11 = scmp.eq.s32.totalorder %s107_s26, 0  ;;  %s191_s29 = sand.u32 (!%p166_p10), 1, %s609_s13  }
  0x10   : > { %169 = sbr.rel (%p166_p10) target bundleno = 424 (0x1a8), region = 32  ;;  %s194_s30 = sadd.s32 (!%p166_p10), %s617_s15, %s621_s16 }
  0x11   : > { %s730_s28 = scalar_select %p108_p11, %s613_s14, %s110_s27  }
  0x12   : > { %s430_s4 = sshll.u32 (!%p166_p10), %s191_s29, 4  ;;  %p195_p12 = scmp.lt.s32.totalorder (!%p166_p10), %s194_s30, 11 }
  0x13   : > { %p201_p13 = scmp.lt.s32.totalorder (!%p166_p10), %s617_s15, 2  ;;  %s745_s26 = scalar_lea.vmem (!%p166_p10), [#allocation3], %s430_s4 }
  0x14   : > { %p434_p0 = scmp.ne.s32.totalorder (!%p166_p10), %s617_s15, 0 }
  0x15   : > { %s836_s30 = smov (!%p195_p12, %s194_s30), 11 }
  0x16   : > { %s202_s5 = scalar_select %p201_p13, %s617_s15, 2 }
  0x17   : > { %s445_s6 = sshll.u32 %s836_s30, 4  ;;  %209 = sbr.rel (%p434_p0) target bundleno = 30 (0x1e), region = 36 }
  0x18   : > { %s199_s9 = scalar_lea.vmem %s816_s0, %s445_s6  ;;  %s433_s10 = sshll.u32 %s202_s5, 2 }
  0x19   : > { %s204_s21 = scalar_lea.vmem %s817_s1, %s433_s10 }
  0x1c   : > { %vm210_vm0 = vcmask 785408   ;;  %v635_v0 = vmov 0.0  }
  0x1d   : > { %211 = vst.msk [vmem:[#allocation2] sm:$0xff] %vm210_vm0, %v635_v0  ;;  %212 = vst.msk [vmem:[#allocation2 + $0x8] sm:$0xff] %vm210_vm0, %v635_v0 }
  0x1e PF: > { %v216_v1 = vld [vmem:[%s204_s21] sm:$0xf]  ;;  %vm224_vm1 = vcmask 1041408   ;;  %v636_v3 = vmov 0.0   ;;  %vm637_vm2 = vmmov 0   ;;  %v214_v5 = vld [vmem:[%s199_s9 + $0x8] sm:$0xff] }
  0x1f   : > { %v213_v2 = vld [vmem:[%s199_s9] sm:$0xff]  ;;  %449 = vmatprep.subr.bf16.mxu0 %v636_v3  ;;  %v217_v4 = vpack.c.bf16 %v216_v1, %v216_v1  ;;  %451 = vmatprep.mubr.msk.bf16.mxu0 %vm637_vm2, %v636_v3  ;;  %vm220_vm3 = vcmask 31744   ;;  %vm271_vm4 = vcmask 785408   ;;  %p436_p1 = scmp.ne.s32.totalorder %s617_s15, 2 }
  0x20   : > { %v215_v7 = vpack.c.bf16 %v214_v5, %v213_v2  ;;  %s638_s4 = smov (!%p436_p1), 64   ;;  %s639_s15 = smov (!%p436_p1), 96  }
  0x21   : > { %v226_v6 = vsel %vm224_vm1, %v217_v4, 0 }
  0x22   : > { %450 = vmatpush3.bf16.msra.mxu0 %v226_v6 }
  0x24   : > { %v218_v8 = vld [vmem:[#allocation2] sm:$0xff]  ;;  %v219_v12 = vld [vmem:[#allocation2 + $0x8] sm:$0xff] }
  0x25   : > { %452 = vmatmul.mubr.msk.bf16.vlgmr.msra.gmra.mxu0 %vm220_vm3, %v215_v7 }
  0xe5   : > { %v262_v9 = vpop.f32.mrf.mxu0 }
  0xe6   : > { %v269_v10 = vadd.f32 %v262_v9, %v218_v8 }
  0xe7   : > { %v453_v11 = vpop.f32.mrf.mxu0 }
  0xe8   : > { %272 = vst.msk [vmem:[#allocation2] sm:$0xff] %vm271_vm4, %v269_v10  ;;  %277 = sbr.rel (%p436_p1) target bundleno = 400 (0x190), region = 40 }
  0xe9   : > { %v265_v13 = vpop.f32.mrf.mxu0 }
  0xea   : > { %v270_v14 = vadd.f32 %v265_v13, %v219_v12 }
  0xeb   : > { %v454_v15 = vpop.f32.mrf.mxu0 }
  0xec   : > { %273 = vst.msk [vmem:[#allocation2 + $0x8] sm:$0xff] %vm271_vm4, %v270_v14 }
  0xed   : > { %v437_v18 = vld [vmem:[%s818_s2] ss:$0 sm:$0xff]  ;;  %vm323_vm5 = vcmask 261120  }
  0xef   : > { %v278_v16 = vld [vmem:[#allocation2] sm:$0xff] }
  0xf0   : > { %v287_v19 = vadd.f32 %v437_v18, %v278_v16 }
  0xf2   : > { %v438_v21 = vmul.f32 -1.442695, %v287_v19  ;;  %313 = vrot.lane.b32.xlu1 %v287_v19, %s638_s4 }
  0xf3   : > { %v279_v17 = vld [vmem:[#allocation2 + $0x8] sm:$0xff] }
  0xf4   : > { %v288_v20 = vadd.f32 %v437_v18, %v279_v17  ;;  %533 = vpow2.f32 %v438_v21 }
  0xf6   : > { %v439_v22 = vmul.f32 -1.442695, %v288_v20  ;;  %315 = vrot.lane.b32.xlu1 %v288_v20, %s638_s4 }
  0xf8   : > { %535 = vpow2.f32 %v439_v22 }
 0x101   : > { %v534_v23 = vpop.eup %533 }
 0x102   : > { %v295_v25 = vadd.f32 1.0, %v534_v23 }
 0x104   : > { %537 = vrcp.f32 %v295_v25 }
 0x105   : > { %v536_v24 = vpop.eup %535 }
 0x106   : > { %v296_v26 = vadd.f32 1.0, %v536_v24 }
 0x108   : > { %539 = vrcp.f32 %v296_v26 }
 0x111   : > { %v538_v27 = vpop.eup %537 }
 0x112   : > { %303 = vrot.lane.b32.xlu0 %v538_v27, %s639_s15 }
 0x115   : > { %v540_v28 = vpop.eup %539 }
 0x116   : > { %305 = vrot.lane.b32.xlu0 %v540_v28, %s639_s15 }
 0x164   : > { %v314_v29 = vpop.permute.xlu1 %313 }
 0x168   : > { %v316_v34 = vpop.permute.xlu1 %315 }
 0x184   : > { %v304_v30 = vpop.permute.xlu0 %303 }
 0x185   : > { %v309_v31 = vmul.f32 %v304_v30, %v287_v19 }
 0x187   : > { %v319_v32 = vadd.f32 %v314_v29, %v309_v31 }
 0x188   : > { %v306_v33 = vpop.permute.xlu0 %305 }
 0x189   : > { %v321_v35 = vmax.f32 %v319_v32, 0.0  ;;  %v310_v36 = vmul.f32 %v306_v33, %v288_v20 }
 0x18b   : > { %324 = vst.msk [vmem:[%s745_s26] sm:$0xff] %vm323_vm5, %v321_v35  ;;  %v320_v37 = vadd.f32 %v316_v34, %v310_v36 }
 0x18d   : > { %v322_v38 = vmax.f32 %v320_v37, 0.0 }
 0x18f   : > { %325 = vst.msk [vmem:[%s745_s26 + $0x8] sm:$0xff] %vm323_vm5, %v322_v38 }
 0x190 PF: > { %s446_s5 = sshll.u32 %s621_s16, 8  ;;  %s340_s9 = sshll.u32 %s745_s26, 4  ;;  %s761_s9 = int_to_ptr.vmem [resolvable:$true] %s340_s9 }
 0x191   : > { %s758_s8 = scalar_lea.hbm %s819_s3, %s446_s5  ;;  %s765_s10 = scalar_lea.sflag [#allocation4], %s191_s29 }
 0x192   : > { %s541_s11 = scalar_lea.vmem %s761_s9, 256  ;;  %s640_s16 = smov [#allocation3]  }
 0x193   : > { %p542_p2 = scmp.ne.s32.totalorder %s761_s9, %s541_s11  ;;  %s545_s20 = sshll.u32 %s640_s16, 4  ;;  %s546_s20 = int_to_ptr.vmem [resolvable:$false] %s545_s20 }
 0x194   : > { %s547_s21 = scalar_lea.vmem %s546_s20, 512  ;;  %p548_p6 = scmp.lt.s32.totalorder %s761_s9, %s546_s20 }
 0x195   : > { %p543_p4 = pnand %p542_p2, %p712_p3  ;;  %p549_p7 = scmp.lt.s32.totalorder %s547_s21, %s541_s11 }
 0x197   : > { %p544_p5 = pneg %p543_p4  ;;  %p550_p8 = por %p549_p7, %p548_p6 }
 0x199   : > { %p551_p10 = pnand %p550_p8, %p544_p5 }
 0x19b   : > { %554 = shalt.err (!%p551_p10)
}
 0x19c   : > { %s555_s29 = scalar_lea.hbm %s758_s8, 256  ;;  %s559_s30 = scalar_lea.hbm %s819_s3, 2560 }
 0x19d   : > { %p556_p11 = scmp.ne.s32.totalorder %s758_s8, %s555_s29  ;;  %p560_p0 = scmp.lt.s32.totalorder %s758_s8, %s819_s3 }
 0x19e   : > { %p561_p1 = scmp.lt.s32.totalorder %s559_s30, %s555_s29 }
 0x19f   : > { %p557_p12 = pnand %p556_p11, %p712_p3 }
 0x1a0   : > { %p562_p2 = por %p561_p1, %p560_p0 }
 0x1a1   : > { %p558_p13 = pneg %p557_p12 }
 0x1a3   : > { %p563_p4 = pnand %p562_p2, %p558_p13 }
 0x1a5   : > { %566 = shalt.err (!%p563_p4)
}
 0x1a6   : > { %s641_s5 = smov 128   ;;  %s642_s6 = smov 8  }
 0x1a7   : > { %455 = dma.vmem_to_hbm [thread:$0]  (%p712_p3), %s761_s9, 256, %s758_s8, %s765_s10, %s641_s5, %s641_s5, %s642_s6  }
 0x1a8 PF: > { %p461_p5 = scmp.ge.s32.totalorder %s633_s19, 2  ;;  %s355_s7 = sand.u32 1, %s605_s12  }
 0x1a9   : > { %s356_s11 = scalar_lea.sflag [#allocation4], %s355_s7 }
 0x1aa   : > { %p458_p6 = pnand %p461_p5, %p722_p9 }
 0x1ac   : > { %p459_p7 = pneg %p458_p6 }
 0x1ae   : > { %600 = dma.done.wait (%p459_p7), %s356_s11, 256  }
 0x1af   : > { %602 = vsyncadd (%p459_p7), %s356_s11, 4294967040  ;;  %s16_s19 = sadd.s32 1, %s633_s19   ;;  %s822_s12 = smov %s609_s13 }
 0x1b0   : > { %p13_p8 = scmp.ge.s32.totalorder %s16_s19, 32   ;;  %s823_s13 = smov %s613_s14 }
 0x1b1   : > { %s824_s14 = smov %s730_s28  ;;  %s825_s15 = smov %s625_s17 }
 0x1b2   : > { %s826_s16 = smov %s629_s18  ;;  %s827_s17 = smov %s830_s22 }
 0x1b3   : > { %s828_s18 = smov %s834_s23  ;;  %15 = sbr.rel (!%p13_p8) target bundleno = 5 (0x5), region = 78 }
 0x1b8   :  { %361 = vsyncpa [#allocation4], 1 }
 0x1b9   :  { %363 = vsyncpa [#allocation4 + $0x1], 1 }

</bundles_post_ra>
